<compile_context>
chip_gen: v7x
topology: tpu7x:2x2x1
jax: 0.10.0
libtpu: 0.0.40
codegen_flags: <defaults>
</compile_context>

<pallas_src>
import jax
import jax.numpy as jnp
from jax.experimental import pallas as pl
from jax.experimental.pallas import tpu as pltpu


def _final_layer_kernel(x_ref, wb_ref, bb_ref, o_ref):
    # x_ref  : (1, TILE_T, H)    token tile of one batch element
    # wb_ref : (1, H, D_out)     per-batch folded weight  (1+scale) * W^T  (x.dtype)
    # bb_ref : (1, 1, D_out)     per-batch folded bias    shift @ W^T + b  (f32)
    # o_ref  : (1, TILE_T, D_out)
    xf = x_ref[0].astype(jnp.float32)                          # (TILE_T, H)
    inv_h = 1.0 / xf.shape[-1]

    # --- LayerNorm (no affine, eps=1e-6): one-pass stats, rsqrt on the EUP ---
    mean = jnp.sum(xf, axis=-1, keepdims=True) * inv_h         # E[x]
    ex2 = jnp.sum(xf * xf, axis=-1, keepdims=True) * inv_h     # E[x^2]
    # Clamp: E[x^2]-E[x]^2 can cancel to a tiny negative in f32; the clamp is
    # one VPU op on a (TILE_T, 1) column, i.e. free.
    var = jnp.maximum(ex2 - mean * mean, 0.0)
    xn = (xf - mean) * jax.lax.rsqrt(var + 1e-6)               # (TILE_T, H)

    # adaLN modulate is folded into the per-batch weight/bias in the wrapper,
    # so there is no wide (TILE_T, H) multiply/add here -- straight to MXU.
    xn = xn.astype(x_ref.dtype)
    out = jnp.dot(xn, wb_ref[0],
                  preferred_element_type=jnp.float32) + bb_ref[0]

    # TODO(synk): D_out (= p^3 * C_out = 32) < 128 lanes so this store is a
    # masked vst; packing 4 rows into one 128-lane row (or fusing the
    # downstream unpatchify) would make the write lane-dense.  Store traffic
    # is ~H/D_out (~36x) smaller than the x read, so the relayout is skipped
    # here to keep in-kernel reshape lowering risk off the critical path.
    o_ref[0] = out.astype(o_ref.dtype)


def final_layer_forward(x, c, w_ada, b_ada, w_lin, b_lin, *, tile_t=None):
    """x: (B, T, H), c: (B, H).
    w_ada: (2H, H) torch-style, b_ada: (2H,)
    w_lin: (D_out, H) torch-style, b_lin: (D_out,)"""
    B, T, H = x.shape
    D_out = w_lin.shape[0]

    # ---- adaLN hoisted to plain JAX (tiny (B,H)@(H,2H) op) ----
    c32 = c.astype(jnp.float32)
    ada = (c32 * jax.nn.sigmoid(c32)) @ w_ada.T.astype(jnp.float32) \
        + b_ada.astype(jnp.float32)                        # (B, 2H)
    shift = ada[:, :H]                                     # (B, H) f32
    scale1 = ada[:, H:] + 1.0                              # pre-fold the +1

    # ---- fold modulate into the final linear (per-batch weight/bias) ----
    wl_t = w_lin.T.astype(jnp.float32)                     # (H, D_out) f32
    w_b = (scale1[:, :, None] * wl_t[None, :, :]).astype(x.dtype)     # (B,H,D_out)
    bias_b = (shift @ wl_t + b_lin.astype(jnp.float32)).reshape(B, 1, D_out)

    # ---- token-dim tiling ----
    if tile_t is None:
        # f32 keeps a wide (TILE_T, H) f32 normalized intermediate alive, so
        # 512 stays comfortably inside v7x's 64 MiB/TC; bf16 inputs halve the
        # dominant x stream, so grow to 1024 (v5e/v6e HBM-bound regime).
        tile_t = 1024 if jnp.dtype(x.dtype).itemsize <= 2 else 512
    tile_t = min(tile_t, T)
    grid_t = pl.cdiv(T, tile_t)

    return pl.pallas_call(
        _final_layer_kernel,
        out_shape=jax.ShapeDtypeStruct((B, T, D_out), x.dtype),
        grid_spec=pltpu.PrefetchScalarGridSpec(
            num_scalar_prefetch=0,
            grid=(B, grid_t),
            in_specs=[
                pl.BlockSpec((1, tile_t, H), lambda b, t: (b, t, 0)),   # x
                pl.BlockSpec((1, H, D_out), lambda b, t: (b, 0, 0)),    # W_b
                pl.BlockSpec((1, 1, D_out), lambda b, t: (b, 0, 0)),    # bias_b
            ],
            out_specs=pl.BlockSpec((1, tile_t, D_out), lambda b, t: (b, t, 0)),
        ),
        compiler_params=pltpu.CompilerParams(
            dimension_semantics=("parallel", "parallel"),
            vmem_limit_bytes=48 * 1024 * 1024),
    )(x, w_b, bias_b)


def final_layer_reference(x, c, w_ada, b_ada, w_lin, b_lin):
    """Plain-JAX reference mirroring the PyTorch module semantics."""
    H = x.shape[-1]
    c_silu = c * jax.nn.sigmoid(c)
    ada = c_silu @ w_ada.T + b_ada                   # (B, 2H)
    shift, scale = ada[:, :H], ada[:, H:]
    mean = jnp.mean(x, axis=-1, keepdims=True)
    var = jnp.mean(jnp.square(x - mean), axis=-1, keepdims=True)
    xn = (x - mean) * jax.lax.rsqrt(var + 1e-6)
    xm = xn * (1.0 + scale[:, None, :]) + shift[:, None, :]
    return xm @ w_lin.T + b_lin


if __name__ == "__main__":
    # Small, module-consistent shapes.
    B, T = 2, 8
    hidden_size = 32
    patch_size = 2
    out_channels = 4
    D_out = patch_size ** 3 * out_channels   # 32

    key = jax.random.PRNGKey(0)
    k_x, k_c, k_wa, k_ba, k_wl, k_bl = jax.random.split(key, 6)

    x = jax.random.normal(k_x, (B, T, hidden_size), dtype=jnp.float32)
    c = jax.random.normal(k_c, (B, hidden_size), dtype=jnp.float32)

    # Deterministic synthetic parameters (nn.Linear conventions).
    w_ada = 0.05 * jax.random.normal(k_wa, (2 * hidden_size, hidden_size), jnp.float32)
    b_ada = 0.05 * jax.random.normal(k_ba, (2 * hidden_size,), jnp.float32)
    w_lin = 0.05 * jax.random.normal(k_wl, (D_out, hidden_size), jnp.float32)
    b_lin = 0.05 * jax.random.normal(k_bl, (D_out,), jnp.float32)

    out = final_layer_forward(x, c, w_ada, b_ada, w_lin, b_lin)
    out = jax.block_until_ready(out)
    ref = final_layer_reference(x, c, w_ada, b_ada, w_lin, b_lin)
    assert out.shape == (B, T, D_out)
    assert jnp.allclose(out, ref, atol=1e-4, rtol=1e-4)

    # Exercise the tiled-T path (grid = (B, T // tile_t) with multiple tiles).
    T2 = 32
    x2 = jax.random.normal(jax.random.fold_in(k_x, 1), (B, T2, hidden_size),
                           dtype=jnp.float32)
    out2 = jax.block_until_ready(
        final_layer_forward(x2, c, w_ada, b_ada, w_lin, b_lin, tile_t=8))
    ref2 = final_layer_reference(x2, c, w_ada, b_ada, w_lin, b_lin)
    assert jnp.allclose(out2, ref2, atol=1e-4, rtol=1e-4)

    print("KERNEL_OK")
</pallas_src>

<mosaic_0001>
module attributes {stable_mosaic.version = 11 : i64} {
  func.func @_final_layer_kernel(%arg0: i32, %arg1: i32, %arg2: memref<1x8x32xf32, #tpu.memory_space<vmem>>, %arg3: memref<1x32x32xf32, #tpu.memory_space<vmem>>, %arg4: memref<1x1x32xf32, #tpu.memory_space<vmem>>, %arg5: memref<1x8x32xf32, #tpu.memory_space<vmem>>) attributes {dimension_semantics = [#tpu.dimension_semantics<parallel>, #tpu.dimension_semantics<parallel>], iteration_bounds = array<i64: 2, 1>, scalar_prefetch = 0 : i64, scratch_operands = 0 : i64, tpu.core_type = #tpu.core_type<tc>, window_params = [{transform_indices = @transform_0, window_bounds = array<i64: 1, 8, 32>}, {transform_indices = @transform_1, window_bounds = array<i64: 1, 32, 32>}, {transform_indices = @transform_2, window_bounds = array<i64: 1, 1, 32>}, {transform_indices = @transform_3, window_bounds = array<i64: 1, 8, 32>}]} {
    %c0 = arith.constant 0 : index
    %c0_0 = arith.constant 0 : index
    %c0_1 = arith.constant 0 : index
    %0 = vector.load %arg2[%c0, %c0_0, %c0_1] : memref<1x8x32xf32, #tpu.memory_space<vmem>>, vector<1x8x32xf32>
    %1 = vector.shape_cast %0 : vector<1x8x32xf32> to vector<8x32xf32>
    %cst = arith.constant dense<0.000000e+00> : vector<8xf32>
    %2 = vector.multi_reduction <add>, %1, %cst [1] : vector<8x32xf32> to vector<8xf32>
    %3 = vector.shape_cast %2 : vector<8xf32> to vector<8x1xf32>
    %cst_2 = arith.constant 3.125000e-02 : f32
    %4 = vector.broadcast %cst_2 : f32 to vector<8x1xf32>
    %5 = arith.mulf %3, %4 : vector<8x1xf32>
    %6 = arith.mulf %1, %1 : vector<8x32xf32>
    %cst_3 = arith.constant dense<0.000000e+00> : vector<8xf32>
    %7 = vector.multi_reduction <add>, %6, %cst_3 [1] : vector<8x32xf32> to vector<8xf32>
    %8 = vector.shape_cast %7 : vector<8xf32> to vector<8x1xf32>
    %cst_4 = arith.constant 3.125000e-02 : f32
    %9 = vector.broadcast %cst_4 : f32 to vector<8x1xf32>
    %10 = arith.mulf %8, %9 : vector<8x1xf32>
    %11 = arith.mulf %5, %5 : vector<8x1xf32>
    %12 = arith.subf %10, %11 : vector<8x1xf32>
    %cst_5 = arith.constant 0.000000e+00 : f32
    %13 = vector.broadcast %cst_5 : f32 to vector<8x1xf32>
    %14 = arith.maximumf %12, %13 : vector<8x1xf32>
    %15 = vector.broadcast %5 : vector<8x1xf32> to vector<8x32xf32>
    %16 = arith.subf %1, %15 : vector<8x32xf32>
    %cst_6 = arith.constant 9.99999997E-7 : f32
    %17 = vector.broadcast %cst_6 : f32 to vector<8x1xf32>
    %18 = arith.addf %14, %17 : vector<8x1xf32>
    %19 = math.rsqrt %18 : vector<8x1xf32>
    %20 = vector.broadcast %19 : vector<8x1xf32> to vector<8x32xf32>
    %21 = arith.mulf %16, %20 : vector<8x32xf32>
    %c0_7 = arith.constant 0 : index
    %c0_8 = arith.constant 0 : index
    %c0_9 = arith.constant 0 : index
    %22 = vector.load %arg3[%c0_7, %c0_8, %c0_9] : memref<1x32x32xf32, #tpu.memory_space<vmem>>, vector<1x32x32xf32>
    %23 = vector.shape_cast %22 : vector<1x32x32xf32> to vector<32x32xf32>
    %cst_10 = arith.constant dense<0.000000e+00> : vector<8x32xf32>
    %24 = tpu.matmul %21, %23, %cst_10 {dimension_numbers = #tpu.dot_dimension_numbers<[1], [0], [0], [1], [0, 0, 1, 1], [], []>} : vector<8x32xf32>, vector<32x32xf32>, vector<8x32xf32> -> vector<8x32xf32>
    %c0_11 = arith.constant 0 : index
    %c0_12 = arith.constant 0 : index
    %c0_13 = arith.constant 0 : index
    %25 = vector.load %arg4[%c0_11, %c0_12, %c0_13] : memref<1x1x32xf32, #tpu.memory_space<vmem>>, vector<1x1x32xf32>
    %26 = vector.shape_cast %25 : vector<1x1x32xf32> to vector<1x32xf32>
    %27 = vector.broadcast %26 : vector<1x32xf32> to vector<8x32xf32>
    %28 = arith.addf %24, %27 : vector<8x32xf32>
    %c0_14 = arith.constant 0 : index
    %c0_15 = arith.constant 0 : index
    %c0_16 = arith.constant 0 : index
    %29 = vector.load %arg5[%c0_14, %c0_15, %c0_16] : memref<1x8x32xf32, #tpu.memory_space<vmem>>, vector<1x8x32xf32>
    %30 = vector.shape_cast %29 : vector<1x8x32xf32> to vector<8x32xf32>
    %31 = vector.shape_cast %28 : vector<8x32xf32> to vector<1x8x32xf32>
    tpu.vector_store %arg5[%c0_14, %c0_15, %c0_16], %31 {strides = array<i32>} : memref<1x8x32xf32, #tpu.memory_space<vmem>>, vector<1x8x32xf32>,
    return
  }
  func.func @transform_0(%arg0: i32, %arg1: i32) -> (i32, i32, i32) {
    %c0_i32 = arith.constant 0 : i32
    %c0_i32_0 = arith.constant 0 : i32
    return %arg0, %arg1, %c0_i32 : i32, i32, i32
  }
  func.func @transform_1(%arg0: i32, %arg1: i32) -> (i32, i32, i32) {
    %c0_i32 = arith.constant 0 : i32
    %c0_i32_0 = arith.constant 0 : i32
    %c0_i32_1 = arith.constant 0 : i32
    return %arg0, %c0_i32, %c0_i32_0 : i32, i32, i32
  }
  func.func @transform_2(%arg0: i32, %arg1: i32) -> (i32, i32, i32) {
    %c0_i32 = arith.constant 0 : i32
    %c0_i32_0 = arith.constant 0 : i32
    %c0_i32_1 = arith.constant 0 : i32
    return %arg0, %c0_i32, %c0_i32_0 : i32, i32, i32
  }
  func.func @transform_3(%arg0: i32, %arg1: i32) -> (i32, i32, i32) {
    %c0_i32 = arith.constant 0 : i32
    %c0_i32_0 = arith.constant 0 : i32
    return %arg0, %arg1, %c0_i32 : i32, i32, i32
  }
}

</mosaic_0001>

<bundles_post_ra>
// kernel: tpu_custom_call.1
= control target key start
LH: loop header
LB: loop body
LE: loop exit
PB: predicated region body
PF: predicated region fallthrough
CT: control target
= control target key end

     0   :  { %8 = vsyncpa [#allocation3], 0  ;;  %s1015_s0 = inlined_call_operand.hbm [shape: f32[2,8,32], index: 0, kind: input, shape index: {}]   ;;  %s1016_s1 = inlined_call_operand.hbm [shape: f32[2,32,32], index: 1, kind: input, shape index: {}]   ;;  %s1017_s2 = inlined_call_operand.vmem [shape: f32[2,1,32], index: 2, kind: input, shape index: {}]   ;;  %s1018_s3 = inlined_call_operand.hbm [shape: f32[2,8,32], index: 3, kind: output, shape index: {}]  }
   0x1   :  { %10 = vsyncpa [#allocation3 + $0x1], 0 }
   0x2   :  { %11 = vsyncpa [#allocation6], 0 }
   0x3   :  { %13 = vsyncpa [#allocation6 + $0x1], 0 }
   0x4   :  { %14 = vsyncpa [#allocation4], 0 }
   0x5   :  { %16 = vsyncpa [#allocation4 + $0x1], 0  ;;  %s779_s12 = smov 0   ;;  %s781_s13 = smov 0  }
   0x6   :  { %s783_s14 = smov 0   ;;  %s785_s15 = smov 0  }
   0x7   :  { %s787_s16 = smov 0   ;;  %s789_s17 = smov 0  }
   0x8 LB: > { %s487_s18 = sadd.s32 4294967295, %s749_s17   ;;  %s488_s19 = sadd.s32 4294967294, %s749_s17   ;;  %s749_s17 = sphi %s789_s17, %s22_s17   ;;  %s745_s16 = sphi %s787_s16, %s1037_s16   ;;  %s741_s15 = sphi %s785_s15, %s1036_s15   ;;  %s737_s14 = sphi %s783_s14, %s1035_s14   ;;  %s733_s13 = sphi %s781_s13, %s1034_s13   ;;  %s729_s12 = sphi %s779_s12, %s1033_s12  }
   0x9   : > { %s34_s20 = sadd.s32 1, %s745_s16  ;;  %s43_s21 = sadd.s32 1, %s737_s14 }
   0xa   : > { %p36_p0 = scmp.ge.s32.totalorder %s34_s20, 2  ;;  %p50_p1 = scmp.ne.s32.totalorder %s737_s14, %s733_s13 }
   0xb   : > { %p51_p2 = scmp.eq.s32.totalorder %s749_s17, 0  ;;  %p56_p3 = scmp.ne.s32.totalorder %s733_s13, %s729_s12 }
   0xc   : > { %s1039_s20 = smov (%p36_p0, %s34_s20), 0  ;;  %p57_p5 = scmp.eq.s32.totalorder %s487_s18, 0 }
   0xd   : > { %p820_p4 = por %p51_p2, %p50_p1  ;;  %s38_s23 = ssub.s32 %s745_s16, %s1039_s20 }
   0xe   : > { %p134_p6 = scmp.eq.s32.totalorder %s487_s18, 1  ;;  %p41_p7 = scmp.eq.s32.totalorder %s38_s23, 0 }
   0xf   : > { %p826_p8 = por %p57_p5, %p56_p3  ;;  %p140_p10 = scmp.eq.s32.totalorder %s488_s19, 1 }
  0x10   : > { %p830_p9 = por %p134_p6, %p50_p1  ;;  %p546_p13 = scmp.lt.s32.totalorder %s749_s17, 2 }
  0x11   : > { %s1022_s24 = scalar_select %p826_p8, 1, 0 }
  0x12   : > { %s1023_s25 = scalar_select %p830_p9, 1, 0 }
  0x13   : > { %s835_s26 = scalar_select %p41_p7, %s737_s14, %s43_s21  }
  0x14   : > { %p837_p11 = por %p140_p10, %p56_p3  ;;  %s844_s28 = sand.u32 1, %s737_s14  }
  0x15   : > { %s491_s29 = sshll.u32 %s844_s28, 3  ;;  %s492_s30 = sshll.u32 %s745_s16, 7 }
  0x16   : > { %s1024_s27 = scalar_select %p837_p11, 1, 0 }
  0x17   : > { %s851_s6 = scalar_lea.hbm %s1015_s0, %s492_s30  ;;  %s164_s7 = scalar_lea.vmem [#allocation2], %s491_s29 }
  0x18   : > { %s172_s8 = sshll.u32 %s164_s7, 4  ;;  %p857_p0 = pnand %p546_p13, %p820_p4  ;;  %s853_s8 = int_to_ptr.vmem [resolvable:$true] %s172_s8 }
  0x19   : > { %s161_s10 = scalar_lea.sflag [#allocation3], %s844_s28  ;;  %s603_s11 = scalar_lea.hbm %s851_s6, 128 }
  0x1a   : > { %p604_p3 = scmp.ne.s32.totalorder %s851_s6, %s603_s11  ;;  %p605_p5 = pneg %p857_p0 }
  0x1b   : > { %s608_s21 = scalar_lea.hbm %s1015_s0, 256  ;;  %p609_p4 = scmp.lt.u32.totalorder %s851_s6, %s1015_s0 }
  0x1c   : > { %p606_p6 = pnand %p605_p5, %p604_p3  ;;  %p610_p10 = scmp.lt.u32.totalorder %s608_s21, %s603_s11 }
  0x1d   : > { %p612_p12 = scmp.lt.u32.totalorder %s603_s11, %s851_s6 }
  0x1e   : > { %p607_p7 = pneg %p606_p6  ;;  %p611_p13 = por %p610_p10, %p609_p4 }
  0x20   : > { %p613_p1 = por %p612_p12, %p611_p13 }
  0x22   : > { %p614_p2 = pnand %p613_p1, %p607_p7 }
  0x24   : > { %617 = shalt.err (!%p614_p2)
}
  0x25   : > { %s618_s29 = scalar_lea.vmem %s853_s8, 128  ;;  %s751_s30 = smov [#allocation2]  }
  0x26   : > { %p619_p3 = scmp.ne.s32.totalorder %s853_s8, %s618_s29  ;;  %s623_s4 = sshll.u32 %s751_s30, 4  ;;  %s624_s4 = int_to_ptr.vmem [resolvable:$false] %s623_s4 }
  0x27   : > { %s625_s5 = scalar_lea.vmem %s624_s4, 256  ;;  %p626_p9 = scmp.lt.s32.totalorder %s853_s8, %s624_s4 }
  0x28   : > { %p621_p6 = pnand %p619_p3, %p605_p5  ;;  %p627_p4 = scmp.lt.s32.totalorder %s625_s5, %s618_s29 }
  0x2a   : > { %p622_p11 = pneg %p621_p6  ;;  %p628_p10 = por %p627_p4, %p626_p9 }
  0x2c   : > { %p629_p12 = pnand %p628_p10, %p622_p11 }
  0x2e   : > { %632 = shalt.err (!%p629_p12)
}
  0x2f   : > { %538 = dma.hbm_to_vmem [thread:$0]  (!%p857_p0), %s851_s6, 128, %s853_s8, %s161_s10  }
  0x30   : > { %p1026_p1 = scmp.lt.s32.totalorder %s749_s17, 3  ;;  %p1027_p2 = scmp.ge.s32.totalorder %s749_s17, 1 }
  0x31   : > { %s493_s11 = sshll.u32 %s844_s28, 5  ;;  %s506_s18 = sshll.u32 %s745_s16, 9 }
  0x32   : > { %p893_p7 = pnand %p1027_p2, %p1026_p1  ;;  %s902_s22 = scalar_lea.hbm %s1016_s1, %s506_s18 }
  0x33   : > { %s183_s23 = scalar_lea.vmem [#allocation5], %s493_s11  ;;  %s180_s6 = scalar_lea.sflag [#allocation6], %s844_s28 }
  0x34   : > { %s190_s29 = sshll.u32 %s183_s23, 4  ;;  %s633_s8 = scalar_lea.hbm %s902_s22, 512  ;;  %s904_s29 = int_to_ptr.vmem [resolvable:$true] %s190_s29 }
  0x35   : > { %p634_p9 = scmp.ne.s32.totalorder %s902_s22, %s633_s8  ;;  %s638_s4 = scalar_lea.hbm %s1016_s1, 1024 }
  0x36   : > { %p639_p3 = scmp.lt.u32.totalorder %s902_s22, %s1016_s1  ;;  %p640_p6 = scmp.lt.u32.totalorder %s638_s4, %s633_s8 }
  0x37   : > { %p636_p11 = pnand %p634_p9, %p605_p5  ;;  %p642_p10 = scmp.lt.u32.totalorder %s633_s8, %s902_s22 }
  0x38   : > { %p641_p4 = por %p640_p6, %p639_p3 }
  0x39   : > { %p637_p13 = pneg %p636_p11 }
  0x3a   : > { %p643_p12 = por %p642_p10, %p641_p4 }
  0x3c   : > { %p644_p1 = pnand %p643_p12, %p637_p13 }
  0x3e   : > { %647 = shalt.err (!%p644_p1)
}
  0x3f   : > { %s648_s11 = scalar_lea.vmem %s904_s29, 512  ;;  %s752_s19 = smov [#allocation5]  }
  0x40   : > { %p649_p2 = scmp.ne.s32.totalorder %s904_s29, %s648_s11  ;;  %s653_s21 = sshll.u32 %s752_s19, 4  ;;  %s654_s21 = int_to_ptr.vmem [resolvable:$false] %s653_s21 }
  0x41   : > { %s655_s23 = scalar_lea.vmem %s654_s21, 1024  ;;  %p656_p8 = scmp.lt.s32.totalorder %s904_s29, %s654_s21 }
  0x42   : > { %p651_p9 = pnand %p649_p2, %p605_p5  ;;  %p657_p3 = scmp.lt.s32.totalorder %s655_s23, %s648_s11 }
  0x44   : > { %p652_p11 = pneg %p651_p9  ;;  %p658_p6 = por %p657_p3, %p656_p8 }
  0x46   : > { %p659_p4 = pnand %p658_p6, %p652_p11 }
  0x48   : > { %662 = shalt.err (!%p659_p4)
}
  0x49   : > { %s753_s8 = smov 128   ;;  %s754_s10 = smov 8  }
  0x4a   : > { %541 = dma.hbm_to_vmem [thread:$0]  (!%p857_p0), %s902_s22, 512, %s904_s29, %s180_s6, %s753_s8, %s753_s8, %s754_s10  }
  0x4b   : > { %208 = sbr.rel (%p893_p7) target bundleno = 483 (0x1e3), region = 32  ;;  %s935_s30 = sand.u32 (!%p893_p7), 1, %s733_s13  }
  0x4c   : > { %s497_s4 = sshll.u32 (!%p893_p7), %s935_s30, 3  ;;  %s211_s5 = scalar_lea.sflag (!%p893_p7), [#allocation3], %s935_s30 }
  0x4d   : > { %s214_s18 = scalar_lea.vmem (!%p893_p7), [#allocation2], %s497_s4  ;;  %p1029_p8 = scmp.ne.s32.totalorder (!%p893_p7), %s1022_s24, 0 }
  0x52   : > { %716 = dma.done.wait (%p1029_p8), %s211_s5, 128  }
  0x53   : > { %718 = vsyncadd (%p1029_p8), %s211_s5, 4294967168  ;;  %s498_s28 = sshll.u32 %s935_s30, 5  ;;  %s220_s9 = scalar_lea.sflag [#allocation6], %s935_s30 }
  0x54   : > { %s223_s7 = scalar_lea.vmem [#allocation5], %s498_s28 }
  0x55   : > { %720 = dma.done.wait (%p1029_p8), %s220_s9, 512  }
  0x56   : > { %722 = vsyncadd (%p1029_p8), %s220_s9, 4294966784  ;;  %vm258_vm0 = vcmask 261120   ;;  %v257_v0 = vld [vmem:[%s214_s18] sm:$0xff]  ;;  %v275_v4 = vld [vmem:[%s223_s7] sm:$0xff]  ;;  %v755_v7 = vmov 0.0|0.0   ;;  %vm756_vm1 = vmmov 0  }
  0x57   : > { %v259_v1 = vsel %vm258_vm0, %v257_v0, 0.0  ;;  %v263_v2 = vmul.f32 %v257_v0, %v257_v0  ;;  %v276_v5 = vld [vmem:[%s223_s7 + $0x8] sm:$0xff]  ;;  %v277_v6 = vld [vmem:[%s223_s7 + $0x10] sm:$0xff]  ;;  %523 = vmatprep.subr.bf16.mxu0 %v755_v7  ;;  %v278_v9 = vld [vmem:[%s223_s7 + $0x18] sm:$0xff]  ;;  %v757_v10 = vmov 0.0   ;;  %p254_p0 = scmp.lt.s32.totalorder %s741_s15, 1 }
  0x58   : > { %260 = vadd.xlane.f32.xlu0 %v259_v1  ;;  %v524_v8 = vpack.c.bf16 %v276_v5, %v275_v4  ;;  %520 = vmatprep.mubr.msk.f32.mxu0 %vm756_vm1, %v757_v10  ;;  %v527_v11 = vpack.c.bf16 %v278_v9, %v277_v6  ;;  %s503_s11 = sshll.u32 %s741_s15, 7  ;;  %s253_s19 = scalar_lea.vmem [#allocation7], %s497_s4 }
  0x59   : > { %v264_v3 = vsel %vm258_vm0, %v263_v2, 0.0  ;;  %s255_s24 = scalar_select %p254_p0, %s741_s15, 1 }
  0x5a   : > { %525 = vmatpush3.bf16.msra.mxu0 %v524_v8  ;;  %s375_s21 = sshll.u32 %s253_s19, 4  ;;  %s965_s10 = scalar_lea.hbm %s1018_s3, %s503_s11  ;;  %s967_s21 = int_to_ptr.vmem [resolvable:$true] %s375_s21 }
  0x5b   : > { %526 = vmatprep.subr.bf16.mxu0 %v755_v7  ;;  %s256_s6 = scalar_lea.vmem %s1017_s2, %s255_s24  ;;  %s361_s5 = scalar_lea.sflag [#allocation4], %s935_s30 }
  0x5c   : > { %265 = vadd.xlane.f32.xlu0 %v264_v3  ;;  %v500_v23 = vld [vmem:[%s256_s6] ss:$0 sm:$0xff]  ;;  %s663_s15 = scalar_lea.vmem %s967_s21, 128  ;;  %p1030_p7 = scmp.ne.s32.totalorder %s1023_s25, 0 }
  0x5d   : > { %p664_p5 = scmp.ne.s32.totalorder %s967_s21, %s663_s15  ;;  %s758_s4 = smov [#allocation7]  }
  0x5e   : > { %528 = vmatpush3.bf16.msra.mxu0 %v527_v11  ;;  %s667_s18 = sshll.u32 %s758_s4, 4  ;;  %s668_s18 = int_to_ptr.vmem [resolvable:$false] %s667_s18 }
  0x5f   : > { %p665_p13 = pnand %p664_p5, %p1030_p7  ;;  %s669_s28 = scalar_lea.vmem %s668_s18, 256 }
  0x60   : > { %p670_p12 = scmp.lt.s32.totalorder %s967_s21, %s668_s18  ;;  %p671_p1 = scmp.lt.s32.totalorder %s669_s28, %s663_s15 }
  0x61   : > { %p666_p10 = pneg %p665_p13 }
  0x62   : > { %p672_p2 = por %p671_p1, %p670_p12 }
  0x64   : > { %p673_p9 = pnand %p672_p2, %p666_p10 }
  0xe5   : > { %v261_v12 = vpop.xlane.xlu0 %260 }
  0xe6   : > { %v262_v13 = vmul.f32 0.03125, %v261_v12 }
  0xe8   : > { %v268_v15 = vmul.f32 %v262_v13, %v262_v13  ;;  %v271_v20 = vsub.f32 %v257_v0, %v262_v13 }
  0xe9   : > { %v266_v14 = vpop.xlane.xlu0 %265 }
  0xea   : > { %v267_v16 = vmul.f32 0.03125, %v266_v14 }
  0xec   : > { %v269_v17 = vsub.f32 %v267_v16, %v268_v15 }
  0xee   : > { %v270_v18 = vmax.f32 %v269_v17, 0.0 }
  0xf0   : > { %v272_v19 = vadd.f32 1e-06, %v270_v18 }
  0xf2   : > { %601 = vrsqrt.f32 %v272_v19 }
  0xfc   : > { %v602_v21 = vpop.eup %601 }
  0xfd   : > { %v274_v22 = vmul.f32 %v602_v21, %v271_v20 }
  0xff   : > { %521 = vmatmul.mubr.msk.f32.vlgmr.msra.gmra.mrb[0].mxu0 %vm258_vm0, %v274_v22 }
 0x1d2   : > { %v355_v24 = vpop.f32.mrb[0].mxu0 }
 0x1d3   : > { %v356_v25 = vadd.f32 %v500_v23, %v355_v24  ;;  %v522_v26 = vpop.f32.mrb[1].mxu0 }
 0x1d5   : > { %359 = vst.msk [vmem:[%s253_s19] sm:$0xff] %vm258_vm0, %v356_v25 }
 0x1d6   : > { %676 = shalt.err (!%p673_p9)
}
 0x1d7   : > { %s677_s30 = scalar_lea.hbm %s965_s10, 128  ;;  %s681_s24 = scalar_lea.hbm %s1018_s3, 256 }
 0x1d8   : > { %p678_p11 = scmp.ne.s32.totalorder %s965_s10, %s677_s30  ;;  %p682_p4 = scmp.lt.u32.totalorder %s965_s10, %s1018_s3 }
 0x1d9   : > { %p683_p8 = scmp.lt.u32.totalorder %s681_s24, %s677_s30  ;;  %p685_p5 = scmp.lt.u32.totalorder %s677_s30, %s965_s10 }
 0x1da   : > { %p679_p3 = pnand %p678_p11, %p1030_p7 }
 0x1db   : > { %p684_p0 = por %p683_p8, %p682_p4 }
 0x1dc   : > { %p680_p6 = pneg %p679_p3 }
 0x1dd   : > { %p686_p13 = por %p685_p5, %p684_p0 }
 0x1df   : > { %p687_p10 = pnand %p686_p13, %p680_p6 }
 0x1e1   : > { %690 = shalt.err (!%p687_p10)
}
 0x1e2   : > { %533 = dma.vmem_to_hbm [thread:$0]  (%p1030_p7), %s967_s21, 128, %s965_s10, %s361_s5  }
 0x1e3 PF: > { %s387_s6 = sand.u32 1, %s729_s12   ;;  %p1031_p12 = scmp.ne.s32.totalorder %s1024_s27, 0 }
 0x1e4   : > { %p1032_p1 = scmp.ge.s32.totalorder %s749_s17, 2  ;;  %s388_s11 = scalar_lea.sflag [#allocation4], %s387_s6 }
 0x1e6   : > { %p543_p2 = pnand %p1032_p1, %p1031_p12 }
 0x1e8   : > { %724 = dma.done.wait (!%p543_p2), %s388_s11, 128  }
 0x1e9   : > { %726 = vsyncadd (!%p543_p2), %s388_s11, 4294967168  ;;  %s22_s17 = sadd.s32 1, %s749_s17   ;;  %s1033_s12 = smov %s733_s13 }
 0x1ea   : > { %p19_p9 = scmp.ge.s32.totalorder %s22_s17, 4   ;;  %s1034_s13 = smov %s737_s14 }
 0x1eb   : > { %s1035_s14 = smov %s835_s26  ;;  %s1036_s15 = smov %s745_s16 }
 0x1ec   : > { %s1037_s16 = smov %s1039_s20  ;;  %21 = sbr.rel (!%p19_p9) target bundleno = 8 (0x8), region = 93 }
 0x1f3   :  { %393 = vsyncpa [#allocation3], 1 }
 0x1f4   :  { %395 = vsyncpa [#allocation3 + $0x1], 1 }
 0x1f5   :  { %396 = vsyncpa [#allocation6], 1 }
 0x1f6   :  { %398 = vsyncpa [#allocation6 + $0x1], 1 }
 0x1f7   :  { %399 = vsyncpa [#allocation4], 1 }
 0x1f8   :  { %401 = vsyncpa [#allocation4 + $0x1], 1 }

</bundles_post_ra>
